<compile_context>
chip_gen: v7x
topology: tpu7x:2x2x1
jax: 0.10.0
libtpu: 0.0.40
codegen_flags: <defaults>
</compile_context>

<pallas_src>
import functools
import math

import jax
import jax.numpy as jnp
from jax.experimental import pallas as pl
from jax.experimental.pallas import tpu as pltpu

_VMEM_LIMIT = 32 * 1024 * 1024  # explicit scoped-VMEM budget (fits v5e/v6e/v7x)


# ----------------------------------------------------------------------------
# small helpers
# ----------------------------------------------------------------------------
def _round_up(x, m):
    return (x + m - 1) // m * m


def _pad_rows(x, rp):
    r = x.shape[0]
    if rp == r:
        return x
    return jnp.pad(x, [(0, rp - r)] + [(0, 0)] * (x.ndim - 1))


def _pad2(x, rp, cp):
    r, c = x.shape
    if rp == r and cp == c:
        return x
    return jnp.pad(x, ((0, rp - r), (0, cp - c)))


def _choose_row_tile(r, mult=16, max_tile=256):
    """Row tile TM (multiple of 16 for bf16 packing) and padded count Rp % TM == 0."""
    rp = _round_up(r, mult)
    if rp <= max_tile:
        return rp, rp
    rp = _round_up(r, max_tile)
    return rp, max_tile


def _choose_m_tile(m):
    # Demo shapes are tiny: favour >=4 grid cells so both v7x TensorCores get work.
    # At realistic sizes pick the largest tile that fits the VMEM budget instead.
    for t in (16, 8):
        if m % t == 0:
            return t
    return m


# ----------------------------------------------------------------------------
# separable trilinear sampling factors (plain JAX; data-dependent one-hots)
# ----------------------------------------------------------------------------
def build_axis_weights(boxes, out_size, D, H, W):
    """boxes: (Nb, 6) -> wz (Nb, pD, D), wyx (Nb, pH*pW, H*W).

    The y and x factors are combined into one small matrix so the pooling stays a
    plain 2D MXU matmul (already a pD*D-fold reduction vs the old dense matrix);
    full x/y/z separation would shrink it further but needs multi-free-dim
    contractions in-kernel.  Matches map_coordinates(order=1, mode="nearest").
    """
    pD, pH, pW = out_size
    nb = boxes.shape[0]

    def axis_coords(lo, hi, n):
        return (lo[:, None]
                + (jnp.arange(n, dtype=jnp.float32)[None, :] + 0.5) * (hi - lo)[:, None] / n
                - 0.5)

    xs = axis_coords(boxes[:, 0], boxes[:, 3], pW)   # (Nb, pW)
    ys = axis_coords(boxes[:, 1], boxes[:, 4], pH)   # (Nb, pH)
    zs = axis_coords(boxes[:, 2], boxes[:, 5], pD)   # (Nb, pD)

    def axis_weights(coords, size):
        c0 = jnp.floor(coords)
        w1 = coords - c0
        w0 = 1.0 - w1
        i0 = jnp.clip(c0.astype(jnp.int32), 0, size - 1)
        i1 = jnp.clip(c0.astype(jnp.int32) + 1, 0, size - 1)
        return (jax.nn.one_hot(i0, size, dtype=jnp.float32) * w0[..., None]
                + jax.nn.one_hot(i1, size, dtype=jnp.float32) * w1[..., None])

    wx = axis_weights(xs, W)   # (Nb, pW, W)
    wy = axis_weights(ys, H)   # (Nb, pH, H)
    wz = axis_weights(zs, D)   # (Nb, pD, D)
    wyx = (wy[:, :, None, :, None] * wx[:, None, :, None, :]).reshape(nb, pH * pW, H * W)
    return wz, wyx


# ----------------------------------------------------------------------------
# Pallas kernels 1a/1b: separable RoI pooling
# ----------------------------------------------------------------------------
def _pool_yx_kernel(wyx_ref, f_ref, o_ref):
    # wyx: (TM, H*W) bf16, f: (H*W, C*D) bf16 -> (TM, C*D) bf16 (f32 accumulation)
    o_ref[...] = jnp.dot(wyx_ref[...], f_ref[...],
                         preferred_element_type=jnp.float32).astype(o_ref.dtype)


def _pool_z_kernel(wz_ref, t_ref, o_ref):
    # wz: (Nb, pD, D), t: (Nb, C, D) -> (Nb, pD, C); contract the shared last dim.
    o_ref[...] = jnp.einsum("nzd,ncd->nzc", wz_ref[...], t_ref[...],
                            preferred_element_type=jnp.float32).astype(o_ref.dtype)


def pallas_roi_pool(wz, wyx, feat_hw_cd, num_channels):
    """Separable ROI pooling.

    wz:  (B, Nb, pD, D)       z-axis factors
    wyx: (B, Nb, pH*pW, H*W)  combined y/x factors
    feat_hw_cd: (B, H*W, C*D) feature map ((h,w) rows, (c,d) cols)
    returns (B, Nb, pH*pW, pD, C) float32; bin ordering is (yh, xw, zd).
    """
    B, Nb, pD, D = wz.shape
    pHW, HW = wyx.shape[2], wyx.shape[3]
    CD = feat_hw_cd.shape[2]
    C = num_channels
    assert CD == C * D
    M = Nb * pHW
    TM = _choose_m_tile(M)

    wyx2 = wyx.reshape(B, M, HW).astype(jnp.bfloat16)

    # stage 1: (y,x) contraction, one plain bf16 MXU matmul per (image, row tile).
    # TODO(synk): at realistic H*W also tile the contraction (K) axis with an
    # f32 accumulator; at demo sizes the whole map fits comfortably in VMEM.
    t1 = pl.pallas_call(
        _pool_yx_kernel,
        out_shape=jax.ShapeDtypeStruct((B, M, CD), jnp.bfloat16),
        grid=(B, M // TM),
        in_specs=[
            pl.BlockSpec((None, TM, HW), lambda b, i: (b, i, 0)),
            pl.BlockSpec((None, HW, CD), lambda b, i: (b, 0, 0)),
        ],
        out_specs=pl.BlockSpec((None, TM, CD), lambda b, i: (b, i, 0)),
        compiler_params=pltpu.CompilerParams(
            dimension_semantics=("parallel", "parallel"),
            vmem_limit_bytes=_VMEM_LIMIT),
    )(wyx2, feat_hw_cd.astype(jnp.bfloat16))

    # free metadata reshape (contiguous split of both dims)
    t1r = t1.reshape(B, Nb, pHW, C, D)

    # stage 2: z contraction, tiny batched matmul per (image, yx-bin).
    out = pl.pallas_call(
        _pool_z_kernel,
        out_shape=jax.ShapeDtypeStruct((B, Nb, pHW, pD, C), jnp.float32),
        grid=(B, pHW),
        in_specs=[
            pl.BlockSpec((None, Nb, pD, D), lambda b, q: (b, 0, 0, 0)),
            pl.BlockSpec((None, Nb, None, C, D), lambda b, q: (b, 0, q, 0, 0)),
        ],
        out_specs=pl.BlockSpec((None, Nb, None, pD, C), lambda b, q: (b, 0, q, 0, 0)),
        compiler_params=pltpu.CompilerParams(
            dimension_semantics=("parallel", "parallel"),
            vmem_limit_bytes=_VMEM_LIMIT),
    )(wz.astype(jnp.bfloat16), t1r)
    return out


# ----------------------------------------------------------------------------
# Pallas kernel 2: fused box head (K-tiled fc6 -> fc7 -> fused predictor ->
# softmax -> vectorized BoxCoder.decode + clip)
# ----------------------------------------------------------------------------
def _box_head_kernel(bf_ref, w6_ref, b6_ref, w7_ref, b7_ref, wcb_ref, bcb_ref,
                     ctr_ref, size_ref, bnd_ref, invw_ref, isctr_ref,
                     scores_ref, boxes_ref, acc_ref, *, num_classes, xform_clip):
    k = pl.program_id(1)

    @pl.when(k == 0)
    def _():
        acc_ref[...] = jnp.zeros_like(acc_ref)

    # fc6 partial product (K-tiled over the flattened pooled features)
    acc_ref[...] += jnp.dot(bf_ref[...], w6_ref[...],
                            preferred_element_type=jnp.float32)

    @pl.when(k == pl.num_programs(1) - 1)
    def _():
        x = jnp.maximum(acc_ref[...] + b6_ref[...], 0.0).astype(jnp.bfloat16)
        x = jnp.dot(x, w7_ref[...], preferred_element_type=jnp.float32) + b7_ref[...]
        x = jnp.maximum(x, 0.0).astype(jnp.bfloat16)

        # fused cls + bbox predictor: one MXU matmul, split in-registers
        y = jnp.dot(x, wcb_ref[...], preferred_element_type=jnp.float32) + bcb_ref[...]
        logits = y[:, :num_classes]
        reg = y[:, num_classes:]

        # softmax over classes (reciprocal on the EUP)
        m = jnp.max(logits, axis=-1, keepdims=True)
        e = jnp.exp(logits - m)
        inv = pl.reciprocal(jnp.sum(e, axis=-1, keepdims=True), approx=True)
        scores_ref[...] = (e * inv).astype(scores_ref.dtype)

        # BoxCoder.decode + clip_boxes_to_image, vectorized across all classes.
        # Columns are [dx,dy,dz,dw,dh,dd] per class; the center/size partner of a
        # column sits +/-3 lanes away (two lane concats, full-width VPU after that).
        is_ctr = isctr_ref[...] > 0.5                       # (1, 6*NC) -> broadcasts
        d = reg * invw_ref[...]
        d_left = jnp.concatenate([d[:, 3:], d[:, :3]], axis=1)    # value at col j+3
        d_right = jnp.concatenate([d[:, -3:], d[:, :-3]], axis=1)  # value at col j-3
        d_other = jnp.where(is_ctr, d_left, d_right)
        d_ctr = jnp.where(is_ctr, d, d_other)
        d_sz = jnp.minimum(jnp.where(is_ctr, d_other, d), xform_clip)
        s_ax = size_ref[...]      # proposal size of axis (col % 3), pre-tiled on host
        c_ax = ctr_ref[...]       # proposal center of axis (col % 3)
        pc = d_ctr * s_ax + c_ax
        half = 0.5 * jnp.exp(d_sz) * s_ax
        val = jnp.where(is_ctr, pc - half, pc + half)
        boxes_ref[...] = jnp.clip(val, 0.0, bnd_ref[...])   # ONE full-width store


def pallas_box_head(box_features, proposals_all, bounds_rows, params,
                    bbox_reg_weights, xform_clip=math.log(1000.0 / 16.0)):
    R, F = box_features.shape
    Hd = params["fc6_w"].shape[1]
    num_classes = params["cls_w"].shape[1]
    C6 = 6 * num_classes

    Rp, TM = _choose_row_tile(R)
    # K tiling of the fc6 contraction (in_feat is large at realistic sizes)
    if F <= 512:
        TK, Fp = F, F
    else:
        TK = 512
        Fp = _round_up(F, TK)
    KT = Fp // TK

    bf = _pad2(box_features.astype(jnp.bfloat16), Rp, Fp)
    w6 = _pad2(params["fc6_w"].astype(jnp.bfloat16), Fp, Hd)
    w7 = params["fc7_w"].astype(jnp.bfloat16)
    wcb = jnp.concatenate([params["cls_w"], params["bbox_w"]], axis=1).astype(jnp.bfloat16)
    b6 = params["fc6_b"].reshape(1, -1).astype(jnp.float32)
    b7 = params["fc7_b"].reshape(1, -1).astype(jnp.float32)
    bcb = jnp.concatenate([params["cls_b"], params["bbox_b"]]).reshape(1, -1).astype(jnp.float32)

    # host pre-tiled decode operands: column j refers to axis j % 3 / role j % 6
    prop = proposals_all.astype(jnp.float32)
    sizes3 = prop[:, 3:6] - prop[:, 0:3]
    ctrs3 = prop[:, 0:3] + 0.5 * sizes3
    size_cols = _pad_rows(jnp.tile(sizes3, (1, 2 * num_classes)), Rp)
    ctr_cols = _pad_rows(jnp.tile(ctrs3, (1, 2 * num_classes)), Rp)
    bnd_cols = _pad_rows(jnp.tile(bounds_rows.astype(jnp.float32), (1, 2 * num_classes)), Rp)
    invw_row = jnp.tile((1.0 / jnp.asarray(bbox_reg_weights, jnp.float32)).reshape(1, 6),
                        (1, num_classes))
    isctr_row = jnp.tile(jnp.asarray([1., 1., 1., 0., 0., 0.], jnp.float32).reshape(1, 6),
                         (1, num_classes))

    row_spec = lambda n: pl.BlockSpec((TM, n), lambda i, k: (i, 0))
    full_spec = lambda shape: pl.BlockSpec(tuple(shape), lambda i, k: (0, 0))

    scores, boxes = pl.pallas_call(
        functools.partial(_box_head_kernel, num_classes=num_classes,
                          xform_clip=float(xform_clip)),
        out_shape=(jax.ShapeDtypeStruct((Rp, num_classes), jnp.float32),
                   jax.ShapeDtypeStruct((Rp, C6), jnp.float32)),
        grid=(Rp // TM, KT),
        in_specs=[
            pl.BlockSpec((TM, TK), lambda i, k: (i, k)),
            pl.BlockSpec((TK, Hd), lambda i, k: (k, 0)),
            full_spec((1, Hd)),
            full_spec((Hd, Hd)),
            full_spec((1, Hd)),
            full_spec((Hd, num_classes + C6)),
            full_spec((1, num_classes + C6)),
            row_spec(C6), row_spec(C6), row_spec(C6),
            full_spec((1, C6)), full_spec((1, C6)),
        ],
        out_specs=(row_spec(num_classes), row_spec(C6)),
        scratch_shapes=[pltpu.VMEM((TM, Hd), jnp.float32)],
        compiler_params=pltpu.CompilerParams(
            dimension_semantics=("parallel", "arbitrary"),
            vmem_limit_bytes=_VMEM_LIMIT),
    )(bf, w6, b6, w7, b7, wcb, bcb, ctr_cols, size_cols, bnd_cols, invw_row, isctr_row)
    return scores[:R], boxes[:R]


# ----------------------------------------------------------------------------
# Pallas kernel 3: fused mask head (per-voxel MLP + full predictor + sigmoid)
# ----------------------------------------------------------------------------
def _mask_head_kernel(vox_ref, w1_ref, b1_ref, w2_ref, b2_ref, wp_ref, bp_ref, o_ref):
    v = jnp.dot(vox_ref[...], w1_ref[...], preferred_element_type=jnp.float32) + b1_ref[...]
    v = jnp.maximum(v, 0.0).astype(jnp.bfloat16)
    v = jnp.dot(v, w2_ref[...], preferred_element_type=jnp.float32) + b2_ref[...]
    v = jnp.maximum(v, 0.0).astype(jnp.bfloat16)
    # full mask predictor on the MXU; class selection happens outside the kernel
    logits = jnp.dot(v, wp_ref[...], preferred_element_type=jnp.float32) + bp_ref[...]
    o_ref[...] = jax.nn.sigmoid(logits).astype(o_ref.dtype)


def pallas_mask_head(vox, params):
    Mv, C = vox.shape
    Hm = params["mask1_w"].shape[1]
    num_classes = params["maskp_w"].shape[1]
    Mp, TM = _choose_row_tile(Mv, max_tile=256)
    voxp = _pad_rows(vox.astype(jnp.bfloat16), Mp)

    row_spec = lambda n: pl.BlockSpec((TM, n), lambda i: (i, 0))
    full_spec = lambda shape: pl.BlockSpec(tuple(shape), lambda i: (0, 0))

    out = pl.pallas_call(
        _mask_head_kernel,
        out_shape=jax.ShapeDtypeStruct((Mp, num_classes), jnp.float32),
        grid=(Mp // TM,),
        in_specs=[
            row_spec(C),
            full_spec(params["mask1_w"].shape), full_spec((1, Hm)),
            full_spec(params["mask2_w"].shape), full_spec((1, Hm)),
            full_spec(params["maskp_w"].shape), full_spec((1, num_classes)),
        ],
        out_specs=row_spec(num_classes),
        compiler_params=pltpu.CompilerParams(
            dimension_semantics=("parallel",),
            vmem_limit_bytes=_VMEM_LIMIT),
    )(voxp,
      params["mask1_w"].astype(jnp.bfloat16),
      params["mask1_b"].reshape(1, -1).astype(jnp.float32),
      params["mask2_w"].astype(jnp.bfloat16),
      params["mask2_b"].reshape(1, -1).astype(jnp.float32),
      params["maskp_w"].astype(jnp.bfloat16),
      params["maskp_b"].reshape(1, -1).astype(jnp.float32))
    return out[:Mv]


# ----------------------------------------------------------------------------
# parameter init (random weights matching the stand-in head/predictor shapes)
# note: fc6_w input features are ordered (yh, xw, zd, c) to match the pooled
# layout emitted by pallas_roi_pool (avoids any pooled-tensor relayout).
# ----------------------------------------------------------------------------
def init_params(key, c_in, pool_size, hidden, num_classes, mask_hidden):
    ks = jax.random.split(key, 8)
    in_feat = c_in * pool_size[0] * pool_size[1] * pool_size[2]

    def lin(k, i, o):
        return 0.1 * jax.random.normal(k, (i, o), jnp.float32)

    return {
        "fc6_w": lin(ks[0], in_feat, hidden), "fc6_b": jnp.zeros((hidden,), jnp.float32),
        "fc7_w": lin(ks[1], hidden, hidden), "fc7_b": jnp.zeros((hidden,), jnp.float32),
        "cls_w": lin(ks[2], hidden, num_classes), "cls_b": jnp.zeros((num_classes,), jnp.float32),
        "bbox_w": lin(ks[3], hidden, num_classes * 6), "bbox_b": jnp.zeros((num_classes * 6,), jnp.float32),
        "mask1_w": lin(ks[4], c_in, mask_hidden), "mask1_b": jnp.zeros((mask_hidden,), jnp.float32),
        "mask2_w": lin(ks[5], mask_hidden, mask_hidden), "mask2_b": jnp.zeros((mask_hidden,), jnp.float32),
        "maskp_w": lin(ks[6], mask_hidden, num_classes), "maskp_b": jnp.zeros((num_classes,), jnp.float32),
    }


# ----------------------------------------------------------------------------
# RoIHeads forward (inference branch)
# ----------------------------------------------------------------------------
def roi_heads_forward(params, features, proposals, image_shapes,
                      score_thresh=0.05, nms_thresh=0.5, detections_per_img=4,
                      pool_size=(2, 2, 2), mask_pool_size=(4, 4, 4),
                      bbox_reg_weights=(10.0, 10.0, 10.0, 5.0, 5.0, 5.0)):
    B, Cf, Dd, Hh, Ww = features.shape
    num_classes = params["cls_w"].shape[1]
    Rb = proposals[0].shape[0]
    assert all(p.shape[0] == Rb for p in proposals)   # static equal per-image counts
    kdet = detections_per_img

    prop_stack = jnp.stack(proposals, axis=0)                             # (B, Rb, 6)
    # feature layout for the separable pool: (h,w) rows, (c,d) columns (one small
    # host transpose of the raw feature map, shared by box + mask pooling).
    feat_hw_cd = features.transpose(0, 3, 4, 1, 2).reshape(B, Hh * Ww, Cf * Dd)

    # --- box_roi_pool: separable trilinear pooling (no dense bins x DHW matrix) ---
    # TODO(synk): spatial_scale between image and feature-map coordinates is assumed
    # 1.0 (true for this demo); a real backbone stride needs boxes * spatial_scale.
    wz_b, wyx_b = jax.vmap(
        lambda bx: build_axis_weights(bx, pool_size, Dd, Hh, Ww))(prop_stack)
    pooled = pallas_roi_pool(wz_b, wyx_b, feat_hw_cd, Cf)    # (B, Rb, pH*pW, pD, Cf)
    R = B * Rb
    box_features = pooled.reshape(R, -1)                     # (yh, xw, zd, c) ordering

    prop_all = prop_stack.reshape(R, 6)
    bounds_rows = jnp.concatenate([
        jnp.broadcast_to(
            jnp.asarray([float(image_shapes[i][1]), float(image_shapes[i][0]),
                         float(image_shapes[i][2])], jnp.float32), (Rb, 3))
        for i in range(B)], axis=0)                                       # per-row (W, H, D)

    # --- box_head + box_predictor + softmax + decode + clip: ONE fused kernel ---
    pred_scores, pred_boxes = pallas_box_head(
        box_features, prop_all, bounds_rows, params, bbox_reg_weights)

    # --- postprocess_detections (batched, fixed-size) ---
    # TODO(synk): batched_nms is data-dependent / dynamic-shape on TPU; replaced by a
    # fixed-size top-k over thresholded scores (nms_thresh is unused); invalid slots
    # are kept with score forced to 0.
    Cm1 = num_classes - 1
    scores = pred_scores.reshape(B, Rb, num_classes)[:, :, 1:].reshape(B, Rb * Cm1)
    boxes = pred_boxes.reshape(B, Rb, num_classes, 6)[:, :, 1:, :].reshape(B, Rb * Cm1, 6)
    labels = jnp.broadcast_to(jnp.arange(1, num_classes, dtype=jnp.int32)[None, None, :],
                              (B, Rb, Cm1)).reshape(B, Rb * Cm1)
    sizes = boxes[..., 3:6] - boxes[..., 0:3]
    valid = (scores > score_thresh) & jnp.all(sizes >= 0.01, axis=-1)
    masked = jnp.where(valid, scores, -jnp.inf)
    top_vals, top_idx = jax.lax.top_k(masked, kdet)                       # (B, kdet)
    det_boxes = jnp.take_along_axis(boxes, top_idx[..., None], axis=1)    # (B, kdet, 6)
    det_labels = jnp.take_along_axis(labels, top_idx, axis=1)             # (B, kdet)
    det_scores = jnp.where(jnp.isfinite(top_vals), top_vals, 0.0)         # (B, kdet)

    result = [{"boxes": det_boxes[i], "scores": det_scores[i], "labels": det_labels[i]}
              for i in range(B)]

    # --- mask branch (has_mask() == True) ---
    mD, mH, mW = mask_pool_size
    Sm = mD * mH * mW
    wz_m, wyx_m = jax.vmap(
        lambda bx: build_axis_weights(bx, mask_pool_size, Dd, Hh, Ww))(det_boxes)
    mpool = pallas_roi_pool(wz_m, wyx_m, feat_hw_cd, Cf)      # (B, kdet, mH*mW, mD, Cf)
    vox = mpool.reshape(B * kdet * Sm, Cf)                    # per-voxel channels-last rows

    # TODO(synk): mask_head is a per-voxel channel MLP (1x1x1 convs); true 3x3x3
    # spatial convs would need an im2col / conv kernel.
    probs = pallas_mask_head(vox, params)                     # (B*kdet*Sm, num_classes)
    probs = probs.reshape(B * kdet, Sm, num_classes)
    # maskrcnn_inference: sigmoid (done in-kernel) then select each ROI's label
    sel = jnp.take_along_axis(
        probs, det_labels.reshape(B * kdet, 1, 1).astype(jnp.int32), axis=2)[..., 0]
    # voxel ordering from the pool is (yh, xw, zd) -> rearrange to (zd, yh, xw)
    mask_prob = sel.reshape(B * kdet, mH, mW, mD).transpose(0, 3, 1, 2)[:, None]

    for i in range(B):
        result[i]["masks"] = mask_prob[i * kdet:(i + 1) * kdet]

    losses = {}  # inference: no losses
    return result, losses


# ----------------------------------------------------------------------------
if __name__ == "__main__":
    key = jax.random.PRNGKey(0)
    k_feat, k_prop1, k_prop2, k_param = jax.random.split(key, 4)

    B, C, D, H, W = 2, 4, 8, 8, 8
    features = jax.random.normal(k_feat, (B, C, D, H, W), jnp.float32)

    # proposals: list of (num_props, 6) boxes (x1,y1,z1,x2,y2,z2) in feature coords
    num_props = 8
    proposals = []
    for kk in (k_prop1, k_prop2):
        ka, kb = jax.random.split(kk)
        lo = jax.random.uniform(ka, (num_props, 3), minval=0.0, maxval=3.5)
        sz = jax.random.uniform(kb, (num_props, 3), minval=2.0, maxval=4.0)
        proposals.append(jnp.concatenate([lo, lo + sz], axis=1).astype(jnp.float32))

    image_shapes = [(H, W, D)] * B  # (H, W, D)

    num_classes = 3   # background + 2 foreground classes
    hidden = 32
    mask_hidden = 8
    params = init_params(k_param, C, (2, 2, 2), hidden, num_classes, mask_hidden)

    result, losses = roi_heads_forward(
        params, features, proposals, image_shapes,
        score_thresh=0.05, nms_thresh=0.5, detections_per_img=4)

    for r in result:
        for v in r.values():
            jax.block_until_ready(v)

    # Sanity-check shapes
    assert result[0]["boxes"].shape == (4, 6)
    assert result[0]["scores"].shape == (4,)
    assert result[0]["labels"].shape == (4,)
    assert result[0]["masks"].shape == (4, 1, 4, 4, 4)
    print("KERNEL_OK")
</pallas_src>

<mosaic_0001>
module attributes {stable_mosaic.version = 11 : i64} {
  func.func @_pool_yx_kernel(%arg0: i32, %arg1: i32, %arg2: memref<1x16x64xbf16, #tpu.memory_space<vmem>>, %arg3: memref<1x64x32xbf16, #tpu.memory_space<vmem>>, %arg4: memref<1x16x32xbf16, #tpu.memory_space<vmem>>) attributes {dimension_semantics = [#tpu.dimension_semantics<parallel>, #tpu.dimension_semantics<parallel>], iteration_bounds = array<i64: 2, 2>, scalar_prefetch = 0 : i64, scratch_operands = 0 : i64, tpu.core_type = #tpu.core_type<tc>, window_params = [{transform_indices = @transform_0, window_bounds = array<i64: 1, 16, 64>}, {transform_indices = @transform_1, window_bounds = array<i64: 1, 64, 32>}, {transform_indices = @transform_2, window_bounds = array<i64: 1, 16, 32>}]} {
    %c0 = arith.constant 0 : index
    %c0_0 = arith.constant 0 : index
    %c0_1 = arith.constant 0 : index
    %0 = vector.load %arg2[%c0, %c0_0, %c0_1] : memref<1x16x64xbf16, #tpu.memory_space<vmem>>, vector<1x16x64xbf16>
    %1 = vector.shape_cast %0 : vector<1x16x64xbf16> to vector<16x64xbf16>
    %c0_2 = arith.constant 0 : index
    %c0_3 = arith.constant 0 : index
    %c0_4 = arith.constant 0 : index
    %2 = vector.load %arg3[%c0_2, %c0_3, %c0_4] : memref<1x64x32xbf16, #tpu.memory_space<vmem>>, vector<1x64x32xbf16>
    %3 = vector.shape_cast %2 : vector<1x64x32xbf16> to vector<64x32xbf16>
    %cst = arith.constant dense<0.000000e+00> : vector<16x32xf32>
    %4 = tpu.matmul %1, %3, %cst {dimension_numbers = #tpu.dot_dimension_numbers<[1], [0], [0], [1], [0, 0, 1, 1], [], []>} : vector<16x64xbf16>, vector<64x32xbf16>, vector<16x32xf32> -> vector<16x32xf32>
    %5 = arith.truncf %4 : vector<16x32xf32> to vector<16x32xbf16>
    %c0_5 = arith.constant 0 : index
    %c0_6 = arith.constant 0 : index
    %c0_7 = arith.constant 0 : index
    %6 = vector.load %arg4[%c0_5, %c0_6, %c0_7] : memref<1x16x32xbf16, #tpu.memory_space<vmem>>, vector<1x16x32xbf16>
    %7 = vector.shape_cast %6 : vector<1x16x32xbf16> to vector<16x32xbf16>
    %8 = vector.shape_cast %5 : vector<16x32xbf16> to vector<1x16x32xbf16>
    tpu.vector_store %arg4[%c0_5, %c0_6, %c0_7], %8 {strides = array<i32>} : memref<1x16x32xbf16, #tpu.memory_space<vmem>>, vector<1x16x32xbf16>,
    return
  }
  func.func @transform_0(%arg0: i32, %arg1: i32) -> (i32, i32, i32) {
    %c0_i32 = arith.constant 0 : i32
    %c0_i32_0 = arith.constant 0 : i32
    return %arg0, %arg1, %c0_i32 : i32, i32, i32
  }
  func.func @transform_1(%arg0: i32, %arg1: i32) -> (i32, i32, i32) {
    %c0_i32 = arith.constant 0 : i32
    %c0_i32_0 = arith.constant 0 : i32
    %c0_i32_1 = arith.constant 0 : i32
    return %arg0, %c0_i32, %c0_i32_0 : i32, i32, i32
  }
  func.func @transform_2(%arg0: i32, %arg1: i32) -> (i32, i32, i32) {
    %c0_i32 = arith.constant 0 : i32
    %c0_i32_0 = arith.constant 0 : i32
    return %arg0, %arg1, %c0_i32 : i32, i32, i32
  }
}

</mosaic_0001>

<bundles_post_ra>
// kernel: tpu_custom_call.1
= control target key start
LH: loop header
LB: loop body
LE: loop exit
PB: predicated region body
PF: predicated region fallthrough
CT: control target
= control target key end

     0   :  { %7 = vsyncpa [#allocation3], 0  ;;  %s786_s0 = inlined_call_operand.vmem [shape: bf16[2,32,64], index: 0, kind: input, shape index: {}]   ;;  %s787_s1 = inlined_call_operand.vmem [shape: bf16[2,64,32], index: 1, kind: input, shape index: {}]   ;;  %s788_s2 = inlined_call_operand.hbm [shape: bf16[2,32,32], index: 2, kind: output, shape index: {}]  }
   0x1   :  { %9 = vsyncpa [#allocation3 + $0x1], 0  ;;  %s640_s9 = smov 0   ;;  %s642_s10 = smov 0  }
   0x2   :  { %s644_s11 = smov 0   ;;  %s646_s12 = smov 0  }
   0x3   :  { %s648_s13 = smov 0   ;;  %s650_s14 = smov 0  }
   0x4   :  { %s652_s15 = smov 0   ;;  %s654_s16 = smov 0  }
   0x5 LB: > { %s399_s17 = sadd.s32 4294967295, %s618_s16   ;;  %s400_s18 = sadd.s32 4294967294, %s618_s16   ;;  %s618_s16 = sphi %s654_s16, %s15_s16   ;;  %s614_s15 = sphi %s652_s15, %s797_s15   ;;  %s610_s14 = sphi %s650_s14, %s796_s14   ;;  %s606_s13 = sphi %s648_s13, %s795_s13   ;;  %s602_s12 = sphi %s646_s12, %s794_s12   ;;  %s598_s11 = sphi %s644_s11, %s793_s11   ;;  %s594_s10 = sphi %s642_s10, %s792_s10   ;;  %s590_s9 = sphi %s640_s9, %s791_s9  }
   0x6   : > { %s24_s19 = sadd.s32 1, %s610_s14  ;;  %s27_s20 = sadd.s32 1, %s614_s15 }
   0x7   : > { %p25_p0 = scmp.ge.s32.totalorder %s24_s19, 2  ;;  %p100_p1 = scmp.ne.s32.totalorder %s598_s11, %s594_s10 }
   0x8   : > { %p101_p2 = scmp.eq.s32.totalorder %s399_s17, 3  ;;  %p106_p5 = scmp.ne.s32.totalorder %s594_s10, %s590_s9 }
   0x9   : > { %s799_s19 = smov (%p25_p0, %s24_s19), 0  ;;  %s801_s20 = smov (!%p25_p0, %s27_s20), %s614_s15 }
   0xa   : > { %s86_s21 = ssub.s32 %s610_s14, %s799_s19  ;;  %p691_p3 = por %p101_p2, %p100_p1 }
   0xb   : > { %p29_p4 = scmp.ge.s32.totalorder %s801_s20, 2  ;;  %p107_p6 = scmp.eq.s32.totalorder %s400_s18, 3 }
   0xc   : > { %p403_p7 = scmp.ge.s32.totalorder %s618_s16, 1  ;;  %p146_p9 = scmp.lt.s32.totalorder %s618_s16, 5 }
   0xd   : > { %s803_s20 = smov (%p29_p4, %s801_s20), 0  ;;  %p700_p8 = por %p107_p6, %p106_p5 }
   0xe   : > { %s85_s24 = ssub.s32 %s614_s15, %s803_s20  ;;  %s90_s25 = sadd.s32 1, %s598_s11 }
   0xf   : > { %s87_s26 = sor.u32 %s86_s21, %s85_s24  ;;  %p147_p10 = pnand %p403_p7, %p146_p9 }
  0x10   : > { %p88_p11 = scmp.eq.s32.totalorder %s87_s26, 0  ;;  %p178_p12 = scmp.lt.s32.totalorder (!%p147_p10), %s606_s13, 1  ;;  %v620_v0 = vmov (!%p147_p10), 0.0   ;;  %vm621_vm0 = vmmov (!%p147_p10), 0   ;;  %vm233_vm1 = vcmask (!%p147_p10), 523264   ;;  %vm286_vm2 = vcmask (!%p147_p10), 257024  }
  0x11   : > { %150 = sbr.rel (%p147_p10) target bundleno = 275 (0x113), region = 28  ;;  %s713_s28 = sshll.u32 (!%p147_p10), %s602_s12, 1  ;;  %432 = vmatprep.subr.bf16.mxu0 (!%p147_p10), %v620_v0  ;;  %440 = vmatprep.mubr.msk.bf16.mxu0 (!%p147_p10), %vm621_vm0, %v620_v0 }
  0x12   : > { %s709_s27 = scalar_select %p88_p11, %s598_s11, %s90_s25  }
  0x13   : > { %p180_p13 = scmp.lt.s32.totalorder (!%p147_p10), %s713_s28, 3  ;;  %s174_s24 = sand.u32 (!%p147_p10), 1, %s594_s10  }
  0x14   : > { %s404_s25 = sshll.u32 (!%p147_p10), %s174_s24, 3  ;;  %s420_s26 = sshll.u32 (!%p147_p10), %s606_s13, 2 }
  0x15   : > { %s734_s6 = scalar_lea.sflag (!%p147_p10), [#allocation3], %s174_s24 }
  0x18   : > { %s179_s29 = scalar_select %p178_p12, %s606_s13, 1 }
  0x19   : > { %s181_s30 = scalar_select %p180_p13, %s713_s28, 3 }
  0x1a   : > { %s424_s3 = sshll.u32 %s179_s29, 5  ;;  %s406_s4 = sshll.u32 %s179_s29, 2 }
  0x1b   : > { %s191_s7 = scalar_lea.vmem %s787_s1, %s424_s3  ;;  %s183_s8 = sadd.s32 %s406_s4, %s181_s30 }
  0x1c   : > { %v519_v1 = vld [vmem:[%s191_s7] sm:$0xff]   ;;  %s407_s12 = sshll.u32 %s183_s8, 2  ;;  %v520_v2 = vld [vmem:[%s191_s7 + $0x8] sm:$0xff]   ;;  %v521_v3 = vld [vmem:[%s191_s7 + $0x10] sm:$0xff]   ;;  %s302_s29 = sadd.s32 %s420_s26, %s713_s28 }
  0x1d   : > { %433 = vmatpush3.bf16.msra.mxu0 %v519_v1  ;;  %s185_s21 = scalar_lea.vmem %s786_s0, %s407_s12  ;;  %v522_v4 = vld [vmem:[%s191_s7 + $0x18] sm:$0xff]   ;;  %s176_s30 = scalar_lea.vmem [#allocation2], %s404_s25 }
  0x1e   : > { %434 = vmatprep.subr.bf16.mxu0 %v620_v0  ;;  %v523_v5 = vld [vmem:[%s185_s21] sm:$0xff]   ;;  %s305_s3 = sshll.u32 %s176_s30, 4  ;;  %s421_s4 = sshll.u32 %s302_s29, 6  ;;  %s727_s3 = int_to_ptr.vmem [resolvable:$true] %s305_s3 }
  0x1f   : > { %s732_s28 = scalar_lea.hbm %s788_s2, %s421_s4  ;;  %s524_s7 = scalar_lea.vmem %s727_s3, 128 }
  0x20   : > { %p525_p0 = scmp.ne.s32.totalorder %s727_s3, %s524_s7  ;;  %s622_s8 = smov [#allocation2]  }
  0x21   : > { %435 = vmatpush3.bf16.msra.mxu0 %v520_v2  ;;  %s528_s12 = sshll.u32 %s622_s8, 4  ;;  %s529_s12 = int_to_ptr.vmem [resolvable:$false] %s528_s12 }
  0x22   : > { %436 = vmatprep.subr.bf16.mxu0 %v620_v0  ;;  %p526_p1 = pnand %p525_p0, %p691_p3  ;;  %s530_s17 = scalar_lea.vmem %s529_s12, 256 }
  0x23   : > { %p531_p4 = scmp.lt.s32.totalorder %s727_s3, %s529_s12  ;;  %p532_p5 = scmp.lt.s32.totalorder %s530_s17, %s524_s7 }
  0x24   : > { %p527_p2 = pneg %p526_p1 }
  0x25   : > { %437 = vmatpush3.bf16.msra.mxu0 %v521_v3  ;;  %p533_p6 = por %p532_p5, %p531_p4 }
  0x26   : > { %438 = vmatprep.subr.bf16.mxu0 %v620_v0 }
  0x27   : > { %p534_p7 = pnand %p533_p6, %p527_p2 }
  0x29   : > { %439 = vmatpush3.bf16.msra.mxu0 %v522_v4 }
  0x2c   : > { %441 = vmatmul.mubr.msk.bf16.vlgmr.msra.gmra.mrb[0].mxu0 %vm233_vm1, %v523_v5 }
  0xff   : > { %v271_v6 = vpop.f32.mrb[0].mxu0 }
 0x100   : > { %v425_v7 = vpack.c.bf16 %v271_v6, %v271_v6  ;;  %v442_v8 = vpop.f32.mrb[1].mxu0 }
 0x101   : > { %v274_v9 = vpop.f32.mrb[2].mxu0 }
 0x102   : > { %287 = vst.msk [vmem:[%s176_s30] sm:$0xf] %vm286_vm2, %v425_v7  ;;  %v426_v10 = vpack.c.bf16 %v274_v9, %v274_v9  ;;  %v443_v11 = vpop.f32.mrb[3].mxu0 }
 0x104   : > { %288 = vst.msk [vmem:[%s176_s30 + $0x4] sm:$0xf] %vm286_vm2, %v426_v10 }
 0x105   : > { %537 = shalt.err (!%p534_p7)
}
 0x106   : > { %s538_s18 = scalar_lea.hbm %s732_s28, 128  ;;  %s542_s25 = scalar_lea.hbm %s788_s2, 512 }
 0x107   : > { %p539_p9 = scmp.ne.s32.totalorder %s732_s28, %s538_s18  ;;  %p543_p12 = scmp.lt.u32.totalorder %s732_s28, %s788_s2 }
 0x108   : > { %p544_p13 = scmp.lt.u32.totalorder %s542_s25, %s538_s18  ;;  %p546_p1 = scmp.lt.u32.totalorder %s538_s18, %s732_s28 }
 0x109   : > { %p540_p10 = pnand %p539_p9, %p691_p3 }
 0x10a   : > { %p545_p0 = por %p544_p13, %p543_p12 }
 0x10b   : > { %p541_p11 = pneg %p540_p10 }
 0x10c   : > { %p547_p2 = por %p546_p1, %p545_p0 }
 0x10e   : > { %p548_p4 = pnand %p547_p2, %p541_p11 }
 0x110   : > { %551 = shalt.err (!%p548_p4)
}
 0x111   : > { %s623_s30 = smov 64   ;;  %s624_s4 = smov 4  }
 0x112   : > { %444 = dma.vmem_to_hbm [thread:$0]  (%p691_p3), %s727_s3, 128, %s732_s28, %s734_s6, %s623_s30, %s623_s30, %s624_s4  }
 0x113 PF: > { %p450_p5 = scmp.ge.s32.totalorder %s618_s16, 2  ;;  %s320_s5 = sand.u32 1, %s590_s9  }
 0x114   : > { %s321_s13 = scalar_lea.sflag [#allocation3], %s320_s5 }
 0x115   : > { %p447_p6 = pnand %p450_p5, %p700_p8 }
 0x117   : > { %585 = dma.done.wait (!%p447_p6), %s321_s13, 128  }
 0x118   : > { %587 = vsyncadd (!%p447_p6), %s321_s13, 4294967168  ;;  %s15_s16 = sadd.s32 1, %s618_s16   ;;  %s791_s9 = smov %s594_s10 }
 0x119   : > { %p12_p7 = scmp.ge.s32.totalorder %s15_s16, 6   ;;  %s792_s10 = smov %s598_s11 }
 0x11a   : > { %s793_s11 = smov %s709_s27  ;;  %s794_s12 = smov %s610_s14 }
 0x11b   : > { %s795_s13 = smov %s614_s15  ;;  %s796_s14 = smov %s799_s19 }
 0x11c   : > { %s797_s15 = smov %s803_s20  ;;  %14 = sbr.rel (!%p12_p7) target bundleno = 5 (0x5), region = 66 }
 0x123   :  { %326 = vsyncpa [#allocation3], 1 }
 0x124   :  { %328 = vsyncpa [#allocation3 + $0x1], 1 }

</bundles_post_ra>
